<compile_context>
chip_gen: v6e
topology: v6e:2x2x1
jax: 0.10.0
libtpu: 0.0.40
codegen_flags: <defaults>
</compile_context>

<pallas_src>
import jax
import jax.numpy as jnp
from jax.experimental import pallas as pl
from jax.experimental.pallas import tpu as pltpu

_LANES = 128
_SUBLANES = 8
_VREG_ELEMS = _LANES * _SUBLANES          # 1024 elements = one f32 vreg
_MAX_TILE_ROWS = 2048                     # (2048, 128) f32 = 1 MiB per array per block


def _bce_logits_kernel(x_ref, y_ref, o_ref):
    # Cast inside the kernel (matches PyTorch's target.float(); output stays f32).
    x = x_ref[...].astype(jnp.float32)
    y = y_ref[...].astype(jnp.float32)
    # Numerically stable BCE-with-logits, elementwise (no reduction).
    o_ref[...] = jnp.maximum(x, 0.0) - x * y + jnp.log1p(jnp.exp(-jnp.abs(x)))


def reconstruction_loss(model_output: jax.Array, target: jax.Array) -> jax.Array:
    """Elementwise BCEWithLogitsLoss (reduce=False), matching the PyTorch module."""
    orig_shape = model_output.shape
    x = model_output.reshape(-1)
    y = target.reshape(-1)
    n = x.shape[0]

    # Pad only to vreg (8, 128) granularity; skipped entirely when already aligned.
    n_pad = pl.cdiv(n, _VREG_ELEMS) * _VREG_ELEMS
    padded = n_pad != n
    if padded:
        x = jnp.pad(x, (0, n_pad - n))
        y = jnp.pad(y, (0, n_pad - n))

    rows = n_pad // _LANES                 # always a multiple of 8
    x2 = x.reshape(rows, _LANES)
    y2 = y.reshape(rows, _LANES)

    # Multi-MiB tiles amortize per-grid-step overhead (~0.35 us/step). For small
    # inputs the tile collapses to the full array (rows itself is 8-aligned), so
    # the (8,128) BlockSpec constraint is always satisfied and no VMEM is wasted.
    tile_rows = min(_MAX_TILE_ROWS, rows)
    grid = (pl.cdiv(rows, tile_rows),)     # tail block (if any) is masked by Pallas

    out2 = pl.pallas_call(
        _bce_logits_kernel,
        out_shape=jax.ShapeDtypeStruct((rows, _LANES), jnp.float32),
        grid_spec=pltpu.PrefetchScalarGridSpec(
            num_scalar_prefetch=0,
            grid=grid,
            in_specs=[
                pl.BlockSpec((tile_rows, _LANES), lambda i: (i, 0)),
                pl.BlockSpec((tile_rows, _LANES), lambda i: (i, 0)),
            ],
            out_specs=pl.BlockSpec((tile_rows, _LANES), lambda i: (i, 0)),
        ),
        compiler_params=pltpu.CompilerParams(
            dimension_semantics=("parallel",),
        ),
    )(x2, y2)

    out = out2.reshape(-1)
    if padded:
        out = out[:n]
    return out.reshape(orig_shape)


def _reference(x, y):
    x = x.astype(jnp.float32)
    y = y.astype(jnp.float32)
    return jnp.maximum(x, 0.0) - x * y + jnp.log1p(jnp.exp(-jnp.abs(x)))


if __name__ == "__main__":
    key = jax.random.PRNGKey(0)
    k1, k2 = jax.random.split(key)
    # Small NCHW shapes consistent with an image-reconstruction head.
    B, C, H, W = 2, 4, 16, 16
    model_output = jax.random.normal(k1, (B, C, H, W), dtype=jnp.float32)
    # Targets are probabilities in [0, 1] (e.g. pixel intensities).
    target = jax.random.uniform(k2, (B, C, H, W), dtype=jnp.float32)

    loss = reconstruction_loss(model_output, target)
    loss = jax.block_until_ready(loss)

    ref = _reference(model_output, target)
    assert loss.shape == (B, C, H, W)
    assert loss.dtype == jnp.float32
    assert jnp.allclose(loss, ref, atol=1e-5, rtol=1e-5)

    print("KERNEL_OK")
</pallas_src>

<mosaic_0001>
module attributes {stable_mosaic.version = 11 : i64} {
  func.func @_bce_logits_kernel(%arg0: i32, %arg1: memref<16x128xf32, #tpu.memory_space<vmem>>, %arg2: memref<16x128xf32, #tpu.memory_space<vmem>>, %arg3: memref<16x128xf32, #tpu.memory_space<vmem>>) attributes {dimension_semantics = [#tpu.dimension_semantics<parallel>], iteration_bounds = array<i64: 1>, scalar_prefetch = 0 : i64, scratch_operands = 0 : i64, tpu.core_type = #tpu.core_type<tc>, window_params = [{transform_indices = @transform_0, window_bounds = array<i64: 16, 128>}, {transform_indices = @transform_1, window_bounds = array<i64: 16, 128>}, {transform_indices = @transform_2, window_bounds = array<i64: 16, 128>}]} {
    %c0 = arith.constant 0 : index
    %c0_0 = arith.constant 0 : index
    %0 = vector.load %arg1[%c0, %c0_0] : memref<16x128xf32, #tpu.memory_space<vmem>>, vector<16x128xf32>
    %c0_1 = arith.constant 0 : index
    %c0_2 = arith.constant 0 : index
    %1 = vector.load %arg2[%c0_1, %c0_2] : memref<16x128xf32, #tpu.memory_space<vmem>>, vector<16x128xf32>
    %cst = arith.constant 0.000000e+00 : f32
    %2 = vector.broadcast %cst : f32 to vector<16x128xf32>
    %3 = arith.maximumf %0, %2 : vector<16x128xf32>
    %4 = arith.mulf %0, %1 : vector<16x128xf32>
    %5 = arith.subf %3, %4 : vector<16x128xf32>
    %6 = math.absf %0 : vector<16x128xf32>
    %cst_3 = arith.constant 0.000000e+00 : f32
    %7 = vector.broadcast %cst_3 : f32 to vector<16x128xf32>
    %8 = arith.subf %7, %6 : vector<16x128xf32>
    %9 = math.exp %8 : vector<16x128xf32>
    %10 = math.log1p %9 : vector<16x128xf32>
    %11 = arith.addf %5, %10 : vector<16x128xf32>
    %c0_4 = arith.constant 0 : index
    %c0_5 = arith.constant 0 : index
    %12 = vector.load %arg3[%c0_4, %c0_5] : memref<16x128xf32, #tpu.memory_space<vmem>>, vector<16x128xf32>
    tpu.vector_store %arg3[%c0_4, %c0_5], %11 {strides = array<i32>} : memref<16x128xf32, #tpu.memory_space<vmem>>, vector<16x128xf32>,
    return
  }
  func.func @transform_0(%arg0: i32) -> (i32, i32) {
    %c0_i32 = arith.constant 0 : i32
    %c0_i32_0 = arith.constant 0 : i32
    return %arg0, %c0_i32 : i32, i32
  }
  func.func @transform_1(%arg0: i32) -> (i32, i32) {
    %c0_i32 = arith.constant 0 : i32
    %c0_i32_0 = arith.constant 0 : i32
    return %arg0, %c0_i32 : i32, i32
  }
  func.func @transform_2(%arg0: i32) -> (i32, i32) {
    %c0_i32 = arith.constant 0 : i32
    %c0_i32_0 = arith.constant 0 : i32
    return %arg0, %c0_i32 : i32, i32
  }
}

</mosaic_0001>

<bundles_post_ra>
// kernel: tpu_custom_call.1
= control target key start
LH: loop header
LB: loop body
LE: loop exit
PB: predicated region body
PF: predicated region fallthrough
CT: control target
= control target key end

     0   :  { %7 = vsyncpa [#allocation3], 0  ;;  %s215_s0 = inlined_call_operand.hbm [shape: f32[16,128], index: 0, kind: input, shape index: {}]   ;;  %s216_s1 = inlined_call_operand.hbm [shape: f32[16,128], index: 1, kind: input, shape index: {}]   ;;  %s217_s2 = inlined_call_operand.hbm [shape: f32[16,128], index: 2, kind: output, shape index: {}]  }
   0x1   :  { %8 = vsyncpa [#allocation6], 0 }
   0x2   :  { %9 = vsyncpa [#allocation4], 0  ;;  %s177_s9 = smov [#allocation2]  }
   0x3   :  { %s15_s10 = sshll.u32 %s177_s9, 4  ;;  %s16_s10 = int_to_ptr.vmem [resolvable:$true] %s15_s10 }
   0x4   :  { %s119_s11 = scalar_lea.vmem %s16_s10, 256  ;;  %p124_p1 = scmp.lt.s32.totalorder %s16_s10, %s16_s10 }
   0x5   :  { %p120_p0 = scmp.ne.s32.totalorder %s16_s10, %s119_s11  ;;  %p125_p2 = scmp.lt.s32.totalorder %s119_s11, %s119_s11 }
   0x7   :  { %p126_p3 = por %p125_p2, %p124_p1 }
   0x9   :  { %p127_p4 = pnand %p126_p3, %p120_p0 }
   0xb   :  { %130 = shalt.err (!%p127_p4)
}
   0xc   :  { %s178_s12 = smov 128   ;;  %s179_s13 = smov 8  }
   0xd   :  { %21 = dma.hbm_to_vmem [thread:$0]  %s215_s0, 256, %s16_s10, [#allocation3], %s178_s12, %s178_s12, %s179_s13  }
   0xe   :  { %s180_s16 = smov [#allocation5]  }
   0xf   :  { %s27_s17 = sshll.u32 %s180_s16, 4  ;;  %s28_s17 = int_to_ptr.vmem [resolvable:$true] %s27_s17 }
  0x10   :  { %s139_s18 = scalar_lea.vmem %s28_s17, 256  ;;  %p144_p6 = scmp.lt.s32.totalorder %s28_s17, %s28_s17 }
  0x11   :  { %p140_p5 = scmp.ne.s32.totalorder %s28_s17, %s139_s18  ;;  %p145_p7 = scmp.lt.s32.totalorder %s139_s18, %s139_s18 }
  0x13   :  { %p146_p8 = por %p145_p7, %p144_p6 }
  0x15   :  { %p147_p9 = pnand %p146_p8, %p140_p5 }
  0x17   :  { %150 = shalt.err (!%p147_p9)
}
  0x18   :  { %33 = dma.hbm_to_vmem [thread:$0]  %s216_s1, 256, %s28_s17, [#allocation6], %s178_s12, %s178_s12, %s179_s13  }
  0x19   :  { %171 = dma.done.wait [#allocation3], 256  }
  0x1a   :  { %172 = vsyncadd [#allocation3], 4294967040 }
  0x1b   :  { %173 = dma.done.wait [#allocation6], 256  }
  0x1c   :  { %174 = vsyncadd [#allocation6], 4294967040  ;;  %v40_v0 = vld [vmem:[#allocation2] sm:$0xff]  ;;  %v41_v1 = vld [vmem:[#allocation2 + $0x8] sm:$0xff]  ;;  %s181_s0 = smov [#allocation7]  }
  0x1d   :  { %v50_v2 = vand.u32 2147483647, %v40_v0  ;;  %v51_v3 = vand.u32 2147483647, %v41_v1  ;;  %v42_v14 = vld [vmem:[#allocation5] sm:$0xff]  ;;  %v43_v15 = vld [vmem:[#allocation5 + $0x8] sm:$0xff] }
  0x1e   :  { %v44_v17 = vmax.f32 %v40_v0, 0.0  ;;  %v46_v18 = vmul.f32 %v42_v14, %v40_v0  ;;  %v45_v21 = vmax.f32 %v41_v1, 0.0  ;;  %v47_v22 = vmul.f32 %v43_v15, %v41_v1  ;;  %s85_s1 = sshll.u32 %s181_s0, 4  ;;  %s86_s1 = int_to_ptr.vmem [resolvable:$true] %s85_s1 }
  0x1f   :  { %v52_v4 = vsub.f32 0.0, %v50_v2  ;;  %v53_v5 = vsub.f32 0.0, %v51_v3  ;;  %s151_s21 = scalar_lea.vmem %s86_s1, 256  ;;  %p156_p11 = scmp.lt.s32.totalorder %s86_s1, %s86_s1 }
  0x20   :  { %v48_v26 = vsub.f32 %v44_v17, %v46_v18  ;;  %v49_v30 = vsub.f32 %v45_v21, %v47_v22  ;;  %p152_p10 = scmp.ne.s32.totalorder %s86_s1, %s151_s21  ;;  %p157_p12 = scmp.lt.s32.totalorder %s151_s21, %s151_s21 }
  0x21   :  { %v54_v6 = vmul.f32 1.442695, %v52_v4  ;;  %v56_v7 = vmul.f32 1.442695, %v53_v5 }
  0x22   :  { %p158_p13 = por %p157_p12, %p156_p11 }
  0x23   :  { %103 = vpow2.f32 %v54_v6 }
  0x24   :  { %105 = vpow2.f32 %v56_v7  ;;  %p159_p0 = pnand %p158_p13, %p152_p10 }
  0x30   :  { %v104_v8 = vpop.eup %103 }
  0x31   :  { %v106_v9 = vpop.eup %105  ;;  %v58_v10 = vadd.f32 1.0, %v104_v8  ;;  %v61_v12 = vmul.f32 -0.5, %v104_v8  ;;  %v64_v19 = vand.u32 2147483647, %v104_v8 }
  0x32   :  { %v67_v11 = vadd.f32 1.0, %v106_v9  ;;  %v70_v13 = vmul.f32 -0.5, %v106_v9  ;;  %v73_v23 = vand.u32 2147483647, %v106_v9 }
  0x33   :  { %107 = vlog2.f32 %v58_v10  ;;  %v62_v16 = vadd.f32 1.0, %v61_v12  ;;  %vm65_vm0 = vcmp.lt.f32.partialorder %v64_v19, 0.0004427343 }
  0x34   :  { %109 = vlog2.f32 %v67_v11  ;;  %v71_v20 = vadd.f32 1.0, %v70_v13  ;;  %vm74_vm1 = vcmp.lt.f32.partialorder %v73_v23, 0.0004427343 }
  0x35   :  { %v63_v24 = vmul.f32 %v104_v8, %v62_v16 }
  0x36   :  { %v72_v27 = vmul.f32 %v106_v9, %v71_v20 }
  0x40   :  { %v108_v25 = vpop.eup %107 }
  0x41   :  { %v110_v28 = vpop.eup %109  ;;  %v60_v29 = vmul.f32 0.6931472, %v108_v25 }
  0x42   :  { %v69_v31 = vmul.f32 0.6931472, %v110_v28 }
  0x43   :  { %v66_v32 = vsel %vm65_vm0, %v63_v24, %v60_v29 }
  0x44   :  { %v76_v33 = vadd.f32 %v66_v32, %v48_v26  ;;  %v75_v34 = vsel %vm74_vm1, %v72_v27, %v69_v31 }
  0x45   :  { %v77_v35 = vadd.f32 %v75_v34, %v49_v30 }
  0x46   :  { %78 = vst [vmem:[#allocation7] sm:$0xff] %v76_v33 }
  0x47   :  { %79 = vst [vmem:[#allocation7 + $0x8] sm:$0xff] %v77_v35 }
  0x48   :  { %162 = shalt.err (!%p159_p0)
}
  0x49   :  { %91 = dma.vmem_to_hbm [thread:$0]  %s86_s1, 256, %s217_s2, [#allocation4], %s178_s12, %s178_s12, %s179_s13  }
  0x4a   :  { %175 = dma.done.wait [#allocation4], 256  }
  0x4b   :  { %176 = vsyncadd [#allocation4], 4294967040 }
  0x4c   :  { %95 = vsyncpa [#allocation3], 1 }
  0x4d   :  { %96 = vsyncpa [#allocation6], 1 }
  0x4e   :  { %97 = vsyncpa [#allocation4], 1 }

</bundles_post_ra>
